<compile_context>
chip_gen: v7x
topology: tpu7x:2x2x1
jax: 0.10.0
libtpu: 0.0.40
codegen_flags: <defaults>
</compile_context>

<pallas_src>
import jax
import jax.numpy as jnp
from jax.experimental import pallas as pl
from jax.experimental.pallas import tpu as pltpu

LANE = 128


def _cdiv(a, b):
    return (a + b - 1) // b


def _round_up(a, b):
    return ((a + b - 1) // b) * b


def _min_grid_steps():
    """>=2 grid steps only on chips with 2 TensorCores per JAX device
    (v4/v5p megacore, v7x); single-TC v5e/v6e use a 1-step grid when the
    whole problem fits in one tile."""
    try:
        kind = jax.devices()[0].device_kind.lower()
    except Exception:
        return 1
    return 2 if any(tag in kind for tag in ("v7", "v4", "v5p")) else 1


def _mlp3_kernel(x_ref, w1_ref, b1_ref, w2_ref, b2_ref, w3_ref, b3_ref, o_ref):
    """3-layer MLP: relu(relu(x@w1+b1)@w2+b2)@w3+b3 (no relu on last layer).

    All matmuls accumulate in f32 on the MXU (native bf16->f32 path when the
    datapath is bf16)."""
    x = x_ref[...]

    h = jnp.dot(x, w1_ref[...], preferred_element_type=jnp.float32) + b1_ref[...]
    h = jnp.maximum(h, 0.0).astype(w2_ref.dtype)

    h = jnp.dot(h, w2_ref[...], preferred_element_type=jnp.float32) + b2_ref[...]
    h = jnp.maximum(h, 0.0).astype(w3_ref.dtype)

    out = jnp.dot(h, w3_ref[...], preferred_element_type=jnp.float32) + b3_ref[...]
    o_ref[...] = out.astype(o_ref.dtype)


def prepare_mlp_params(params, *, compute_dtype=None):
    """One-time parameter prep (call once, reuse the result every forward).

    - zero-pads the hidden width (and, if needed, the contraction width) to a
      multiple of 128 so intermediates fill full vregs;
    - leaves the final out_dim columns UNPADDED (the kernel stores a narrow,
      contiguous output block instead of a padded slab);
    - optionally casts the weights to `compute_dtype` (e.g. bf16) for the MXU.
    """
    w1, b1 = params["w1"], params["b1"]
    w2, b2 = params["w2"], params["b2"]
    w3, b3 = params["w3"], params["b3"]

    in_dim, hid = w1.shape
    out_dim = w3.shape[1]

    if compute_dtype is not None:
        cast = lambda a: a.astype(compute_dtype)
        w1, b1, w2, b2, w3, b3 = map(cast, (w1, b1, w2, b2, w3, b3))

    in_p = _round_up(in_dim, LANE)
    hid_p = _round_up(hid, LANE)

    w1p = jnp.pad(w1, ((0, in_p - in_dim), (0, hid_p - hid)))
    b1p = jnp.pad(b1, ((0, 0), (0, hid_p - hid)))
    w2p = jnp.pad(w2, ((0, hid_p - hid), (0, hid_p - hid)))
    b2p = jnp.pad(b2, ((0, 0), (0, hid_p - hid)))
    w3p = jnp.pad(w3, ((0, hid_p - hid), (0, 0)))  # out columns NOT padded

    return dict(w1=w1p, b1=b1p, w2=w2p, b2=b2p, w3=w3p, b3=b3,
                in_dim=in_dim, out_dim=out_dim)


def _choose_tile_m(m, row_align, tile_m_max, min_steps):
    tile_m_max = max(row_align, _round_up(tile_m_max, row_align))
    if min_steps <= 1:
        # Single TensorCore: one step if it fits (no pipeline-epilogue cost).
        tile = min(tile_m_max, _round_up(m, row_align))
    else:
        # 2-TC devices: an even number of steps so both cores get equal rows.
        steps = min_steps * max(1, _cdiv(_cdiv(m, tile_m_max), min_steps))
        tile = min(tile_m_max, _round_up(_cdiv(m, steps), row_align))
    return max(row_align, tile)


def _fit_tile_to_vmem(tile_m, row_align, in_p, hid_p, out_dim, act_itemsize,
                      weight_bytes, budget_bytes):
    """Clamp tile_m so the working set fits the scoped VMEM budget (valid on
    every generation, including v7x's 64 MiB physical / 32 MiB scoped)."""
    def need(t):
        io = 2 * t * (in_p + out_dim) * act_itemsize   # double-buffered x / out blocks
        inter = 2 * t * hid_p * 4                      # f32 intermediates per block
        return io + inter + 2 * weight_bytes           # resident (double-buffered) weights
    while tile_m > row_align and need(tile_m) > budget_bytes:
        tile_m = max(row_align, _round_up(tile_m // 2, row_align))
    return tile_m


def mlp_forward(x, prepped, *, tile_m_max=1024, vmem_limit_bytes=32 * 1024 * 1024):
    """Run the 3-layer MLP Pallas kernel.

    x:        [..., input_dim]
    prepped:  output of prepare_mlp_params (pre-padded / pre-cast weights).
    """
    w1p, b1p = prepped["w1"], prepped["b1"]
    w2p, b2p = prepped["w2"], prepped["b2"]
    w3p, b3 = prepped["w3"], prepped["b3"]
    in_dim, out_dim = prepped["in_dim"], prepped["out_dim"]
    in_p, hid_p = w1p.shape

    assert x.shape[-1] == in_dim, (x.shape, in_dim)
    lead_shape = x.shape[:-1]
    out_dtype = x.dtype

    x2d = x.reshape(-1, in_dim)
    if x2d.dtype != w1p.dtype:
        x2d = x2d.astype(w1p.dtype)            # optional bf16 datapath
    if in_p != in_dim:
        # Contraction dim not lane-aligned (never for d_model=256): zero-pad.
        x2d = jnp.pad(x2d, ((0, 0), (0, in_p - in_dim)))
    m = x2d.shape[0]

    itemsize = x2d.dtype.itemsize
    row_align = 8 if itemsize >= 4 else (16 if itemsize == 2 else 32)

    weight_bytes = sum(int(a.size) * a.dtype.itemsize
                       for a in (w1p, b1p, w2p, b2p, w3p, b3))

    tile_m = _choose_tile_m(m, row_align, tile_m_max, _min_grid_steps())
    tile_m = _fit_tile_to_vmem(tile_m, row_align, in_p, hid_p, out_dim,
                               itemsize, weight_bytes,
                               budget_bytes=(3 * vmem_limit_bytes) // 4)
    grid = (_cdiv(m, tile_m),)

    # Advisory cost for XLA's scheduler (real, unpadded-out dims).
    cost = pl.CostEstimate(
        flops=2 * m * (in_p * hid_p + hid_p * hid_p + hid_p * out_dim),
        transcendentals=0,
        bytes_accessed=(m * in_p * itemsize
                        + m * out_dim * out_dtype.itemsize
                        + weight_bytes),
    )

    # Small weights/biases: VMEM-resident via constant index_maps (no re-DMA
    # across grid steps).
    rep = lambda a: pl.BlockSpec(a.shape, lambda i: (0, 0))

    out2d = pl.pallas_call(
        _mlp3_kernel,
        out_shape=jax.ShapeDtypeStruct((m, out_dim), out_dtype),
        grid_spec=pltpu.PrefetchScalarGridSpec(
            num_scalar_prefetch=0,
            grid=grid,
            in_specs=[
                pl.BlockSpec((tile_m, in_p), lambda i: (i, 0)),  # x row tile
                rep(w1p), rep(b1p),
                rep(w2p), rep(b2p),
                rep(w3p), rep(b3),
            ],
            # Narrow (tile_m, out_dim) store: contiguous in HBM, negligible
            # masked-vst cost, and it removes the padded-slab + wrapper-slice
            # double pass over HBM.
            out_specs=pl.BlockSpec((tile_m, out_dim), lambda i: (i, 0)),
        ),
        compiler_params=pltpu.CompilerParams(
            dimension_semantics=("parallel",),
            vmem_limit_bytes=vmem_limit_bytes,
        ),
        cost_estimate=cost,
    )(x2d, w1p, b1p, w2p, b2p, w3p, b3)

    return out2d.reshape(*lead_shape, out_dim)


def init_mlp_params(key, input_dim, hidden_dim, output_dim, num_layers=3,
                    dtype=jnp.float32):
    """Deterministic init mimicking nn.Linear shapes (kaiming-uniform-ish)."""
    assert num_layers == 3, "kernel specialized to num_layers=3"
    dims = [input_dim] + [hidden_dim] * (num_layers - 1) + [output_dim]
    params = {}
    for li in range(num_layers):
        n_in, n_out = dims[li], dims[li + 1]
        key, kw, kb = jax.random.split(key, 3)
        bound = 1.0 / (n_in ** 0.5)
        # stored already transposed: (in, out)
        params[f"w{li+1}"] = jax.random.uniform(
            kw, (n_in, n_out), dtype, minval=-bound, maxval=bound)
        params[f"b{li+1}"] = jax.random.uniform(
            kb, (1, n_out), dtype, minval=-bound, maxval=bound)
    return params


def mlp_reference(x, params):
    """Pure-JAX reference of the same forward."""
    h = x
    h = jax.nn.relu(h @ params["w1"] + params["b1"][0])
    h = jax.nn.relu(h @ params["w2"] + params["b2"][0])
    return h @ params["w3"] + params["b3"][0]


if __name__ == "__main__":
    # Shapes consistent with e.g. the bbox-embed head: MLP(d_model, d_model, 4, 3)
    batch, seq = 2, 8
    input_dim, hidden_dim, output_dim, num_layers = 32, 32, 4, 3

    key = jax.random.PRNGKey(0)
    kx, kp = jax.random.split(key)
    x = jax.random.normal(kx, (batch, seq, input_dim), jnp.float32)
    params = init_mlp_params(kp, input_dim, hidden_dim, output_dim, num_layers)

    ref = mlp_reference(x, params)

    # One-time weight prep (padding) hoisted out of the per-call path.
    prepped_f32 = prepare_mlp_params(params)
    out = jax.block_until_ready(mlp_forward(x, prepped_f32))
    assert out.shape == (batch, seq, output_dim), out.shape
    assert jnp.allclose(out, ref, atol=1e-5, rtol=1e-5), "f32 mismatch vs reference"

    # Optional bf16 datapath (f32 MXU accumulation). Numerics-affecting opt-in,
    # so only a loose-tolerance sanity check against the f32 reference.
    prepped_bf16 = prepare_mlp_params(params, compute_dtype=jnp.bfloat16)
    out_bf16 = jax.block_until_ready(
        mlp_forward(x.astype(jnp.bfloat16), prepped_bf16))
    assert out_bf16.shape == (batch, seq, output_dim), out_bf16.shape
    assert jnp.allclose(out_bf16.astype(jnp.float32), ref, atol=0.1, rtol=0.1), \
        "bf16 mismatch vs reference"

    print("KERNEL_OK")
</pallas_src>

<mosaic_0001>
module attributes {stable_mosaic.version = 11 : i64} {
  func.func @_mlp3_kernel(%arg0: i32, %arg1: memref<16x128xf32, #tpu.memory_space<vmem>>, %arg2: memref<128x128xf32, #tpu.memory_space<vmem>>, %arg3: memref<1x128xf32, #tpu.memory_space<vmem>>, %arg4: memref<128x128xf32, #tpu.memory_space<vmem>>, %arg5: memref<1x128xf32, #tpu.memory_space<vmem>>, %arg6: memref<128x4xf32, #tpu.memory_space<vmem>>, %arg7: memref<1x4xf32, #tpu.memory_space<vmem>>, %arg8: memref<16x4xf32, #tpu.memory_space<vmem>>) attributes {dimension_semantics = [#tpu.dimension_semantics<parallel>], iteration_bounds = array<i64: 1>, scalar_prefetch = 0 : i64, scratch_operands = 0 : i64, tpu.core_type = #tpu.core_type<tc>, window_params = [{transform_indices = @transform_0, window_bounds = array<i64: 16, 128>}, {pipeline_mode = #tpu.pipeline_mode<synchronous>, transform_indices = @transform_1, window_bounds = array<i64: 128, 128>}, {pipeline_mode = #tpu.pipeline_mode<synchronous>, transform_indices = @transform_2, window_bounds = array<i64: 1, 128>}, {pipeline_mode = #tpu.pipeline_mode<synchronous>, transform_indices = @transform_3, window_bounds = array<i64: 128, 128>}, {pipeline_mode = #tpu.pipeline_mode<synchronous>, transform_indices = @transform_4, window_bounds = array<i64: 1, 128>}, {pipeline_mode = #tpu.pipeline_mode<synchronous>, transform_indices = @transform_5, window_bounds = array<i64: 128, 4>}, {pipeline_mode = #tpu.pipeline_mode<synchronous>, transform_indices = @transform_6, window_bounds = array<i64: 1, 4>}, {transform_indices = @transform_7, window_bounds = array<i64: 16, 4>}]} {
    %c0 = arith.constant 0 : index
    %c0_0 = arith.constant 0 : index
    %0 = vector.load %arg1[%c0, %c0_0] : memref<16x128xf32, #tpu.memory_space<vmem>>, vector<16x128xf32>
    %c0_1 = arith.constant 0 : index
    %c0_2 = arith.constant 0 : index
    %1 = vector.load %arg2[%c0_1, %c0_2] : memref<128x128xf32, #tpu.memory_space<vmem>>, vector<128x128xf32>
    %cst = arith.constant dense<0.000000e+00> : vector<16x128xf32>
    %2 = tpu.matmul %0, %1, %cst {dimension_numbers = #tpu.dot_dimension_numbers<[1], [0], [0], [1], [0, 0, 1, 1], [], []>} : vector<16x128xf32>, vector<128x128xf32>, vector<16x128xf32> -> vector<16x128xf32>
    %c0_3 = arith.constant 0 : index
    %c0_4 = arith.constant 0 : index
    %3 = vector.load %arg3[%c0_3, %c0_4] : memref<1x128xf32, #tpu.memory_space<vmem>>, vector<1x128xf32>
    %4 = vector.broadcast %3 : vector<1x128xf32> to vector<16x128xf32>
    %5 = arith.addf %2, %4 : vector<16x128xf32>
    %cst_5 = arith.constant 0.000000e+00 : f32
    %6 = vector.broadcast %cst_5 : f32 to vector<16x128xf32>
    %7 = arith.maximumf %5, %6 : vector<16x128xf32>
    %c0_6 = arith.constant 0 : index
    %c0_7 = arith.constant 0 : index
    %8 = vector.load %arg4[%c0_6, %c0_7] : memref<128x128xf32, #tpu.memory_space<vmem>>, vector<128x128xf32>
    %cst_8 = arith.constant dense<0.000000e+00> : vector<16x128xf32>
    %9 = tpu.matmul %7, %8, %cst_8 {dimension_numbers = #tpu.dot_dimension_numbers<[1], [0], [0], [1], [0, 0, 1, 1], [], []>} : vector<16x128xf32>, vector<128x128xf32>, vector<16x128xf32> -> vector<16x128xf32>
    %c0_9 = arith.constant 0 : index
    %c0_10 = arith.constant 0 : index
    %10 = vector.load %arg5[%c0_9, %c0_10] : memref<1x128xf32, #tpu.memory_space<vmem>>, vector<1x128xf32>
    %11 = vector.broadcast %10 : vector<1x128xf32> to vector<16x128xf32>
    %12 = arith.addf %9, %11 : vector<16x128xf32>
    %cst_11 = arith.constant 0.000000e+00 : f32
    %13 = vector.broadcast %cst_11 : f32 to vector<16x128xf32>
    %14 = arith.maximumf %12, %13 : vector<16x128xf32>
    %c0_12 = arith.constant 0 : index
    %c0_13 = arith.constant 0 : index
    %15 = vector.load %arg6[%c0_12, %c0_13] : memref<128x4xf32, #tpu.memory_space<vmem>>, vector<128x4xf32>
    %cst_14 = arith.constant dense<0.000000e+00> : vector<16x4xf32>
    %16 = tpu.matmul %14, %15, %cst_14 {dimension_numbers = #tpu.dot_dimension_numbers<[1], [0], [0], [1], [0, 0, 1, 1], [], []>} : vector<16x128xf32>, vector<128x4xf32>, vector<16x4xf32> -> vector<16x4xf32>
    %c0_15 = arith.constant 0 : index
    %c0_16 = arith.constant 0 : index
    %17 = vector.load %arg7[%c0_15, %c0_16] : memref<1x4xf32, #tpu.memory_space<vmem>>, vector<1x4xf32>
    %18 = vector.broadcast %17 : vector<1x4xf32> to vector<16x4xf32>
    %19 = arith.addf %16, %18 : vector<16x4xf32>
    %c0_17 = arith.constant 0 : index
    %c0_18 = arith.constant 0 : index
    %20 = vector.load %arg8[%c0_17, %c0_18] : memref<16x4xf32, #tpu.memory_space<vmem>>, vector<16x4xf32>
    tpu.vector_store %arg8[%c0_17, %c0_18], %19 {strides = array<i32>} : memref<16x4xf32, #tpu.memory_space<vmem>>, vector<16x4xf32>,
    return
  }
  func.func @transform_0(%arg0: i32) -> (i32, i32) {
    %c0_i32 = arith.constant 0 : i32
    %c0_i32_0 = arith.constant 0 : i32
    return %arg0, %c0_i32 : i32, i32
  }
  func.func @transform_1(%arg0: i32) -> (i32, i32) {
    %c0_i32 = arith.constant 0 : i32
    %c0_i32_0 = arith.constant 0 : i32
    %c0_i32_1 = arith.constant 0 : i32
    return %c0_i32, %c0_i32_0 : i32, i32
  }
  func.func @transform_2(%arg0: i32) -> (i32, i32) {
    %c0_i32 = arith.constant 0 : i32
    %c0_i32_0 = arith.constant 0 : i32
    %c0_i32_1 = arith.constant 0 : i32
    return %c0_i32, %c0_i32_0 : i32, i32
  }
  func.func @transform_3(%arg0: i32) -> (i32, i32) {
    %c0_i32 = arith.constant 0 : i32
    %c0_i32_0 = arith.constant 0 : i32
    %c0_i32_1 = arith.constant 0 : i32
    return %c0_i32, %c0_i32_0 : i32, i32
  }
  func.func @transform_4(%arg0: i32) -> (i32, i32) {
    %c0_i32 = arith.constant 0 : i32
    %c0_i32_0 = arith.constant 0 : i32
    %c0_i32_1 = arith.constant 0 : i32
    return %c0_i32, %c0_i32_0 : i32, i32
  }
  func.func @transform_5(%arg0: i32) -> (i32, i32) {
    %c0_i32 = arith.constant 0 : i32
    %c0_i32_0 = arith.constant 0 : i32
    %c0_i32_1 = arith.constant 0 : i32
    return %c0_i32, %c0_i32_0 : i32, i32
  }
  func.func @transform_6(%arg0: i32) -> (i32, i32) {
    %c0_i32 = arith.constant 0 : i32
    %c0_i32_0 = arith.constant 0 : i32
    %c0_i32_1 = arith.constant 0 : i32
    return %c0_i32, %c0_i32_0 : i32, i32
  }
  func.func @transform_7(%arg0: i32) -> (i32, i32) {
    %c0_i32 = arith.constant 0 : i32
    %c0_i32_0 = arith.constant 0 : i32
    return %arg0, %c0_i32 : i32, i32
  }
}

</mosaic_0001>

<bundles_post_ra>
// kernel: tpu_custom_call.1
= control target key start
LH: loop header
LB: loop body
LE: loop exit
PB: predicated region body
PF: predicated region fallthrough
CT: control target
= control target key end

     0   :  { %12 = vsyncpa [#allocation3], 0  ;;  %s852_s0 = inlined_call_operand.hbm [shape: f32[16,128], index: 0, kind: input, shape index: {}]   ;;  %s853_s1 = inlined_call_operand.vmem [shape: f32[128,128], index: 1, kind: input, shape index: {}]   ;;  %s854_s2 = inlined_call_operand.vmem [shape: f32[1,128], index: 2, kind: input, shape index: {}]   ;;  %s855_s3 = inlined_call_operand.hbm [shape: f32[128,128], index: 3, kind: input, shape index: {}]   ;;  %s856_s4 = inlined_call_operand.vmem [shape: f32[1,128], index: 4, kind: input, shape index: {}]   ;;  %s857_s5 = inlined_call_operand.vmem [shape: f32[128,4], index: 5, kind: input, shape index: {}]   ;;  %s858_s6 = inlined_call_operand.vmem [shape: f32[1,4], index: 6, kind: input, shape index: {}]   ;;  %s859_s7 = inlined_call_operand.vmem [shape: f32[16,4], index: 7, kind: output, shape index: {}]  }
   0x1   :  { %13 = vsyncpa [#allocation5], 0  ;;  %s673_s24 = smov [#allocation2]   ;;  %s625_s28 = scalar_lea.hbm %s852_s0, 256 }
   0x2   :  { %s19_s25 = sshll.u32 %s673_s24, 4  ;;  %p626_p0 = scmp.ne.s32.totalorder %s852_s0, %s625_s28  ;;  %s20_s25 = int_to_ptr.vmem [resolvable:$true] %s19_s25 }
   0x3   :  { %p629_p1 = scmp.lt.u32.totalorder %s625_s28, %s852_s0 }
   0x5   :  { %p631_p2 = pnand %p629_p1, %p626_p0 }
   0x7   :  { %634 = shalt.err (!%p631_p2)
}
   0x8   :  { %s635_s10 = scalar_lea.vmem %s20_s25, 256  ;;  %p640_p4 = scmp.lt.s32.totalorder %s20_s25, %s20_s25 }
   0x9   :  { %p636_p3 = scmp.ne.s32.totalorder %s20_s25, %s635_s10  ;;  %p641_p5 = scmp.lt.s32.totalorder %s635_s10, %s635_s10 }
   0xb   :  { %p642_p6 = por %p641_p5, %p640_p4 }
   0xd   :  { %p643_p7 = pnand %p642_p6, %p636_p3 }
   0xf   :  { %646 = shalt.err (!%p643_p7)
}
  0x10   :  { %s674_s11 = smov 128   ;;  %s675_s12 = smov 8  }
  0x11   :  { %25 = dma.hbm_to_vmem [thread:$0]  %s852_s0, 256, %s20_s25, [#allocation3], %s674_s11, %s674_s11, %s675_s12  }
  0x12   :  { %s676_s15 = smov [#allocation4]   ;;  %s647_s19 = scalar_lea.hbm %s855_s3, 2048 }
  0x13   :  { %s35_s16 = sshll.u32 %s676_s15, 4  ;;  %p648_p8 = scmp.ne.s32.totalorder %s855_s3, %s647_s19  ;;  %s36_s16 = int_to_ptr.vmem [resolvable:$true] %s35_s16 }
  0x14   :  { %p651_p9 = scmp.lt.u32.totalorder %s647_s19, %s855_s3 }
  0x16   :  { %p653_p10 = pnand %p651_p9, %p648_p8 }
  0x18   :  { %656 = shalt.err (!%p653_p10)
}
  0x19   :  { %s657_s24 = scalar_lea.vmem %s36_s16, 2048  ;;  %p662_p12 = scmp.lt.s32.totalorder %s36_s16, %s36_s16 }
  0x1a   :  { %p658_p11 = scmp.ne.s32.totalorder %s36_s16, %s657_s24  ;;  %p663_p13 = scmp.lt.s32.totalorder %s657_s24, %s657_s24 }
  0x1c   :  { %p664_p0 = por %p663_p13, %p662_p12 }
  0x1e   :  { %p665_p1 = pnand %p664_p0, %p658_p11 }
  0x20   :  { %668 = shalt.err (!%p665_p1)
}
  0x21   :  { %41 = dma.hbm_to_vmem [thread:$0]  %s855_s3, 2048, %s36_s16, [#allocation5], %s674_s11, %s674_s11, %s675_s12  }
  0x22   :  { %669 = dma.done.wait [#allocation3], 256  }
  0x23   :  { %670 = vsyncadd [#allocation3], 4294967040 }
  0x24   :  { %671 = dma.done.wait [#allocation5], 2048  }
  0x25   :  { %672 = vsyncadd [#allocation5], 4294965248  ;;  %v56_v0 = vld [vmem:[%s853_s1] sm:$0xff]  ;;  %v57_v1 = vld [vmem:[%s853_s1 + $0x8] sm:$0xff]  ;;  %vm354_vm0 = vcmask 31744  }
  0x26   :  { %v58_v2 = vld [vmem:[%s853_s1 + $0x10] sm:$0xff]  ;;  %v525_v3 = vpack.c.bf16 %v57_v1, %v56_v0  ;;  %v59_v4 = vld [vmem:[%s853_s1 + $0x18] sm:$0xff]  ;;  %v60_v6 = vld [vmem:[%s853_s1 + $0x20] sm:$0xff] }
  0x27   :  { %v529_v5 = vpack.c.bf16 %v59_v4, %v58_v2  ;;  %v61_v7 = vld [vmem:[%s853_s1 + $0x28] sm:$0xff]  ;;  %v62_v9 = vld [vmem:[%s853_s1 + $0x30] sm:$0xff]  ;;  %v63_v10 = vld [vmem:[%s853_s1 + $0x38] sm:$0xff] }
  0x28   :  { %526 = vmatprep.subr.bf16.mxu0 %v525_v3  ;;  %v533_v8 = vpack.c.bf16 %v61_v7, %v60_v6  ;;  %v54_v11 = vld [vmem:[#allocation2] sm:$0xff]  ;;  %v156_v12 = vld [vmem:[#allocation4] sm:$0xff]  ;;  %v157_v13 = vld [vmem:[#allocation4 + $0x8] sm:$0xff]  ;;  %v537_v20 = vpack.c.bf16 %v63_v10, %v62_v9 }
  0x29   :  { %528 = vmatpush3.bf16.msra.mxu0 %v525_v3  ;;  %452 = vmatprep.mubr.f32.mxu0 %v54_v11  ;;  %v158_v14 = vld [vmem:[#allocation4 + $0x10] sm:$0xff]  ;;  %v557_v15 = vpack.c.bf16 %v157_v13, %v156_v12  ;;  %v159_v16 = vld [vmem:[#allocation4 + $0x18] sm:$0xff]  ;;  %v160_v18 = vld [vmem:[#allocation4 + $0x20] sm:$0xff] }
  0x2a   :  { %530 = vmatprep.subr.bf16.mxu0 %v529_v5  ;;  %v561_v17 = vpack.c.bf16 %v159_v16, %v158_v14  ;;  %v161_v19 = vld [vmem:[#allocation4 + $0x28] sm:$0xff]  ;;  %v64_v21 = vld [vmem:[%s853_s1 + $0x40] sm:$0xff]  ;;  %v65_v22 = vld [vmem:[%s853_s1 + $0x48] sm:$0xff] }
  0x2b   :  { %558 = vmatprep.subr.bf16.mxu1 %v557_v15  ;;  %v565_v23 = vpack.c.bf16 %v161_v19, %v160_v18  ;;  %v162_v24 = vld [vmem:[#allocation4 + $0x30] sm:$0xff]  ;;  %v163_v25 = vld [vmem:[#allocation4 + $0x38] sm:$0xff]  ;;  %v541_v26 = vpack.c.bf16 %v65_v22, %v64_v21  ;;  %v66_v27 = vld [vmem:[%s853_s1 + $0x50] sm:$0xff] }
  0x2c   :  { %560 = vmatpush3.bf16.msra.mxu1 %v557_v15  ;;  %v67_v28 = vld [vmem:[%s853_s1 + $0x58] sm:$0xff]  ;;  %v569_v29 = vpack.c.bf16 %v163_v25, %v162_v24  ;;  %v164_v30 = vld [vmem:[#allocation4 + $0x40] sm:$0xff]  ;;  %v68_v33 = vld [vmem:[%s853_s1 + $0x60] sm:$0xff] }
  0x2d   :  { %532 = vmatpush3.bf16.msra.mxu0 %v529_v5  ;;  %562 = vmatprep.subr.bf16.mxu1 %v561_v17  ;;  %v165_v31 = vld [vmem:[#allocation4 + $0x48] sm:$0xff]  ;;  %v545_v32 = vpack.c.bf16 %v67_v28, %v66_v27  ;;  %v69_v34 = vld [vmem:[%s853_s1 + $0x68] sm:$0xff]  ;;  %v166_v36 = vld [vmem:[#allocation4 + $0x50] sm:$0xff] }
  0x2e   :  { %534 = vmatprep.subr.bf16.mxu0 %v533_v8  ;;  %v573_v35 = vpack.c.bf16 %v165_v31, %v164_v30  ;;  %v167_v37 = vld [vmem:[#allocation4 + $0x58] sm:$0xff]  ;;  %v549_v38 = vpack.c.bf16 %v69_v34, %v68_v33  ;;  %v70_v39 = vld [vmem:[%s853_s1 + $0x70] sm:$0xff]  ;;  %v71_v40 = vld [vmem:[%s853_s1 + $0x78] sm:$0xff] }
  0x2f   :  { %v577_v41 = vpack.c.bf16 %v167_v37, %v166_v36  ;;  %v168_v42 = vld [vmem:[#allocation4 + $0x60] sm:$0xff]  ;;  %v169_v43 = vld [vmem:[#allocation4 + $0x68] sm:$0xff]  ;;  %v553_v44 = vpack.c.bf16 %v71_v40, %v70_v39  ;;  %v55_v46 = vld [vmem:[#allocation2 + $0x8] sm:$0xff] }
  0x30   :  { %564 = vmatpush3.bf16.msra.mxu1 %v561_v17  ;;  %v581_v45 = vpack.c.bf16 %v169_v43, %v168_v42  ;;  %v170_v47 = vld [vmem:[#allocation4 + $0x70] sm:$0xff]  ;;  %v171_v48 = vld [vmem:[#allocation4 + $0x78] sm:$0xff]  ;;  %v258_v52 = vld [vmem:[%s857_s5 + $0x10] sm:$0xff] }
  0x31   :  { %536 = vmatpush3.bf16.msra.mxu0 %v533_v8  ;;  %566 = vmatprep.subr.bf16.mxu1 %v565_v23  ;;  %v585_v49 = vpack.c.bf16 %v171_v48, %v170_v47  ;;  %v256_v50 = vld [vmem:[%s857_s5] sm:$0xff]  ;;  %v257_v51 = vld [vmem:[%s857_s5 + $0x8] sm:$0xff]  ;;  %v259_v54 = vld [vmem:[%s857_s5 + $0x18] sm:$0xff] }
  0x32   :  { %538 = vmatprep.subr.bf16.mxu0 %v537_v20  ;;  %v589_v53 = vpack.c.bf16 %v257_v51, %v256_v50  ;;  %v593_v55 = vpack.c.bf16 %v259_v54, %v258_v52  ;;  %v260_v56 = vld [vmem:[%s857_s5 + $0x20] sm:$0xff]  ;;  %v261_v57 = vld [vmem:[%s857_s5 + $0x28] sm:$0xff]  ;;  %v262_v59 = vld [vmem:[%s857_s5 + $0x30] sm:$0xff] }
  0x33   :  { %v597_v58 = vpack.c.bf16 %v261_v57, %v260_v56  ;;  %v263_v60 = vld [vmem:[%s857_s5 + $0x38] sm:$0xff]  ;;  %v264_v62 = vld [vmem:[%s857_s5 + $0x40] sm:$0xff]  ;;  %v265_v63 = vld [vmem:[%s857_s5 + $0x48] sm:$0xff] }
  0x34   :  { %568 = vmatpush3.bf16.msra.mxu1 %v565_v23  ;;  %v601_v61 = vpack.c.bf16 %v263_v60, %v262_v59  ;;  %v605_v0 = vpack.c.bf16 %v265_v63, %v264_v62  ;;  %v266_v1 = vld [vmem:[%s857_s5 + $0x50] sm:$0xff]  ;;  %v267_v2 = vld [vmem:[%s857_s5 + $0x58] sm:$0xff]  ;;  %v268_v4 = vld [vmem:[%s857_s5 + $0x60] sm:$0xff] }
  0x35   :  { %540 = vmatpush3.bf16.msra.mxu0 %v537_v20  ;;  %570 = vmatprep.subr.bf16.mxu1 %v569_v29  ;;  %v609_v3 = vpack.c.bf16 %v267_v2, %v266_v1  ;;  %v269_v5 = vld [vmem:[%s857_s5 + $0x68] sm:$0xff]  ;;  %v363_v7 = vld [vmem:[%s854_s2] ss:$0 sm:$0xff]  ;;  %v270_v14 = vld [vmem:[%s857_s5 + $0x70] sm:$0xff] }
  0x36   :  { %542 = vmatprep.subr.bf16.mxu0 %v541_v26  ;;  %v613_v6 = vpack.c.bf16 %v269_v5, %v268_v4  ;;  %v271_v15 = vld [vmem:[%s857_s5 + $0x78] sm:$0xff]  ;;  %v364_v17 = vld [vmem:[%s856_s4] ss:$0 sm:$0xff] }
  0x37   :  { %v617_v16 = vpack.c.bf16 %v271_v15, %v270_v14  ;;  %v365_v24 = vld [vmem:[%s858_s6] ss:$0 sm:$0xff] }
  0x38   :  { %572 = vmatpush3.bf16.msra.mxu1 %v569_v29 }
  0x39   :  { %544 = vmatpush3.bf16.msra.mxu0 %v541_v26  ;;  %574 = vmatprep.subr.bf16.mxu1 %v573_v35 }
  0x3a   :  { %546 = vmatprep.subr.bf16.mxu0 %v545_v32 }
  0x3c   :  { %576 = vmatpush3.bf16.msra.mxu1 %v573_v35 }
  0x3d   :  { %548 = vmatpush3.bf16.msra.mxu0 %v545_v32  ;;  %578 = vmatprep.subr.bf16.mxu1 %v577_v41 }
  0x3e   :  { %550 = vmatprep.subr.bf16.mxu0 %v549_v38 }
  0x40   :  { %580 = vmatpush3.bf16.msra.mxu1 %v577_v41 }
  0x41   :  { %552 = vmatpush3.bf16.msra.mxu0 %v549_v38  ;;  %582 = vmatprep.subr.bf16.mxu1 %v581_v45 }
  0x42   :  { %554 = vmatprep.subr.bf16.mxu0 %v553_v44 }
  0x44   :  { %584 = vmatpush3.bf16.msra.mxu1 %v581_v45 }
  0x45   :  { %556 = vmatpush3.bf16.msra.mxu0 %v553_v44  ;;  %586 = vmatprep.subr.bf16.mxu1 %v585_v49 }
  0x46   :  { %590 = vmatprep.subr.bf16.mxu0 %v589_v53 }
  0x48   :  { %453 = vmatmul.mubr.f32.vlgmr.msra.gmra.mrb[0].mxu0 %v55_v46  ;;  %588 = vmatpush3.bf16.msra.mxu1 %v585_v49 }
  0x49   :  { %592 = vmatpush3.bf16.msra.mxu0 %v589_v53 }
  0x4a   :  { %594 = vmatprep.subr.bf16.mxu0 %v593_v55 }
  0x4d   :  { %596 = vmatpush3.bf16.msra.mxu0 %v593_v55 }
  0x4e   :  { %598 = vmatprep.subr.bf16.mxu0 %v597_v58 }
  0x51   :  { %600 = vmatpush3.bf16.msra.mxu0 %v597_v58 }
  0x52   :  { %602 = vmatprep.subr.bf16.mxu0 %v601_v61 }
  0x55   :  { %604 = vmatpush3.bf16.msra.mxu0 %v601_v61 }
  0x56   :  { %606 = vmatprep.subr.bf16.mxu0 %v605_v0 }
  0x59   :  { %608 = vmatpush3.bf16.msra.mxu0 %v605_v0 }
  0x5a   :  { %610 = vmatprep.subr.bf16.mxu0 %v609_v3 }
  0x5d   :  { %612 = vmatpush3.bf16.msra.mxu0 %v609_v3 }
  0x5e   :  { %614 = vmatprep.subr.bf16.mxu0 %v613_v6 }
  0x61   :  { %616 = vmatpush3.bf16.msra.mxu0 %v613_v6 }
  0x62   :  { %618 = vmatprep.subr.bf16.mxu0 %v617_v16 }
  0x65   :  { %620 = vmatpush3.bf16.msra.mxu0 %v617_v16 }
 0x11b   :  { %v454_v8 = vpop.f32.mrb[0].mxu0 }
 0x11c   :  { %v151_v9 = vadd.f32 %v454_v8, %v363_v7  ;;  %v145_v10 = vpop.f32.mrb[1].mxu0 }
 0x11d   :  { %v146_v11 = vadd.f32 %v363_v7, %v145_v10 }
 0x11e   :  { %v155_v13 = vmax.f32 %v151_v9, 0.0 }
 0x11f   :  { %v154_v12 = vmax.f32 %v146_v11, 0.0 }
 0x121   :  { %487 = vmatprep.mubr.f32.mxu1 %v154_v12 }
 0x122   :  { %488 = vmatmul.mubr.f32.vlgmr.msra.gmra.mrb[0].mxu1 %v155_v13 }
 0x1f5   :  { %v489_v18 = vpop.f32.mrb[0].mxu1 }
 0x1f6   :  { %v251_v19 = vadd.f32 %v489_v18, %v364_v17  ;;  %v245_v20 = vpop.f32.mrb[1].mxu1 }
 0x1f7   :  { %v246_v21 = vadd.f32 %v364_v17, %v245_v20 }
 0x1f8   :  { %v255_v23 = vmax.f32 %v251_v19, 0.0 }
 0x1f9   :  { %v254_v22 = vmax.f32 %v246_v21, 0.0 }
 0x1fb   :  { %522 = vmatprep.mubr.f32.mxu0 %v254_v22 }
 0x1fc   :  { %523 = vmatmul.mubr.f32.vlgmr.msra.gmra.mrb[2].mxu0 %v255_v23 }
 0x2cf   :  { %v524_v25 = vpop.f32.mrb[2].mxu0 }
 0x2d0   :  { %v351_v26 = vadd.f32 %v524_v25, %v365_v24  ;;  %v345_v27 = vpop.f32.mrb[3].mxu0 }
 0x2d1   :  { %v346_v28 = vadd.f32 %v365_v24, %v345_v27 }
 0x2d2   :  { %356 = vst.msk [vmem:[%s859_s7 + $0x8] sm:$0xff] %vm354_vm0, %v351_v26 }
 0x2d3   :  { %355 = vst.msk [vmem:[%s859_s7] sm:$0xff] %vm354_vm0, %v346_v28 }
 0x2d4   :  { %361 = vsyncpa [#allocation3], 1 }
 0x2d5   :  { %362 = vsyncpa [#allocation5], 1 }

</bundles_post_ra>
